<compile_context>
chip_gen: v6e
topology: v6e:2x2x1
jax: 0.10.0
libtpu: 0.0.40
codegen_flags: <defaults>
</compile_context>

<pallas_src>
import math
import jax
import jax.numpy as jnp
from jax.experimental import pallas as pl
from jax.experimental.pallas import tpu as pltpu


# ----------------------------------------------------------------------------
# Diffusion schedule (matches noise_schedule() in the PyTorch module)
# ----------------------------------------------------------------------------
def noise_schedule(T, s=0.008):
    steps = T + 1
    t = jnp.linspace(0.0, float(steps), steps)
    f = jnp.cos((t / steps + s) * math.pi / (2 + 2 * s)) ** 2
    alphas_bar = f / f[0]
    betas = 1.0 - alphas_bar[1:] / alphas_bar[:-1]
    return jnp.clip(betas, 0.0, 0.999)


def make_schedule(T):
    betas = noise_schedule(T)
    alphas = 1.0 - betas
    alphas_bar = jnp.cumprod(alphas)
    return {
        "sqrt_alphas_bar": jnp.sqrt(alphas_bar).astype(jnp.float32),
        "sqrt_one_minus_alphas_bar": jnp.sqrt(1.0 - alphas_bar).astype(jnp.float32),
    }


def _default_num_groups(B):
    """2-way parallel grid on dual-TensorCore chips (v7x), 1 otherwise."""
    try:
        kind = jax.devices()[0].device_kind.lower()
    except Exception:
        return 1
    if "7" in kind and B % 2 == 0:
        return 2
    return 1


# ----------------------------------------------------------------------------
# Pallas kernel
# Layout: activations are (rows, HW) with HW on lanes, rows = batches*channels
# packed along sublanes.  Per-row coefficients travel in one (rows, 4) aux
# operand: [:,0]=sqrt_alphas_bar, [:,1]=sqrt_1m_alphas_bar, [:,2]=bias1
# (bc1 + time embedding), [:,3]=bc2.  Weights are block-diagonal [row_out,
# row_in] matrices.  Output is a single SMEM scalar per grid step.
# ----------------------------------------------------------------------------
def _conv1x1_packed(w, inp, bias):
    """h[r,:] = bias[r] + sum_r' w[r, r'] * inp[r',:]  (unrolled, tree-summed)."""
    rows = inp.shape[0]
    terms = [w[:, r:r + 1] * inp[r:r + 1, :] for r in range(rows)]
    while len(terms) > 1:                     # pairwise tree: log2(rows) depth
        nxt = [terms[i] + terms[i + 1] for i in range(0, len(terms) - 1, 2)]
        if len(terms) % 2:
            nxt.append(terms[-1])
        terms = nxt
    return terms[0] + bias


def ddpm_kernel(x_ref,     # VMEM (1, rows, HW)
                nz_ref,    # VMEM (1, rows, HW)
                aux_ref,   # VMEM (1, rows, 4)   per-row [sa, sb, bias1, bc2]
                w1_ref,    # VMEM (rows, rows)   block-diag conv1 weight
                w2_ref,    # VMEM (rows, rows)   block-diag conv2 weight
                out_ref):  # SMEM (1, 1)         per-group L1 partial sum
    x = x_ref[0]           # (rows, HW)
    nz = nz_ref[0]
    aux = aux_ref[0]       # (rows, 4)
    sa = aux[:, 0:1]
    sb = aux[:, 1:2]
    bias1 = aux[:, 2:3]
    bc2 = aux[:, 3:4]

    # q(): forward diffusion mix (VPU)
    img_noise = sa * x + sb * nz

    # synthetic denoise model: 1x1 conv -> SiLU -> 1x1 conv
    h = _conv1x1_packed(w1_ref[...], img_noise, bias1)
    h = h * jax.nn.sigmoid(h)                         # SiLU (EUP)
    recon = _conv1x1_packed(w2_ref[...], h, bc2)

    # per-group L1 partial sum -> single SMEM scalar (no VMEM writeback)
    out_ref[0, 0] = jnp.sum(jnp.abs(img_noise - recon))


# ----------------------------------------------------------------------------
# Wrapper
# ----------------------------------------------------------------------------
def ddpm_forward_loss(x_nchw, noise_nchw, t, params, sched, num_timesteps,
                      num_groups=None):
    B, C, H, W = x_nchw.shape
    HW = H * W
    if num_groups is None:
        num_groups = _default_num_groups(B)
    G = num_groups
    assert B % G == 0
    Bg = B // G            # batches per grid step
    rows = Bg * C          # packed sublane rows per grid step

    # NCHW is channel-major / spatial-minor: pure reshapes give the packed
    # lane-dense (G, rows, HW) layout -- no transpose, no extra HBM traffic.
    x = x_nchw.reshape(G, rows, HW).astype(jnp.float32)
    nz = noise_nchw.reshape(G, rows, HW).astype(jnp.float32)

    # per-batch schedule coefficients (extract())
    sa = sched["sqrt_alphas_bar"][t]                               # (B,)
    sb = sched["sqrt_one_minus_alphas_bar"][t]                     # (B,)

    # tiny time-MLP of the synthetic denoise model (B x hidden, negligible glue)
    t_norm = (t.astype(jnp.float32) / num_timesteps)[:, None]      # (B, 1)
    h_t = t_norm @ params["w1"] + params["b1"]
    h_t = h_t * jax.nn.sigmoid(h_t)
    temb = (h_t @ params["w2"] + params["b2"]).astype(jnp.float32)  # (B, C)

    # per-row (row = b*C + c) auxiliary columns, packed into ONE operand
    sa_col = jnp.repeat(sa, C)                                      # (B*C,)
    sb_col = jnp.repeat(sb, C)                                      # (B*C,)
    bias1_col = (params["bc1"] + temb).reshape(B * C)               # bc1 + temb
    bc2_col = jnp.tile(params["bc2"].reshape(-1), B)                # (B*C,)
    aux = jnp.stack([sa_col, sb_col, bias1_col, bc2_col], axis=-1)  # (B*C, 4)
    aux = aux.reshape(G, rows, 4).astype(jnp.float32)

    # block-diagonal [row_out, row_in] weights for the packed-row layout
    w1t = params["wc1"].T.astype(jnp.float32)                       # [c_out, c_in]
    w2t = params["wc2"].T.astype(jnp.float32)
    eye = jnp.eye(Bg, dtype=jnp.float32)
    w1blk = jnp.kron(eye, w1t)                                      # (rows, rows)
    w2blk = jnp.kron(eye, w2t)

    partial = pl.pallas_call(
        ddpm_kernel,
        out_shape=jax.ShapeDtypeStruct((G, 1), jnp.float32),
        grid_spec=pltpu.PrefetchScalarGridSpec(
            num_scalar_prefetch=0,
            grid=(G,),
            in_specs=[
                pl.BlockSpec((1, rows, HW), lambda g: (g, 0, 0)),   # x
                pl.BlockSpec((1, rows, HW), lambda g: (g, 0, 0)),   # noise
                pl.BlockSpec((1, rows, 4), lambda g: (g, 0, 0)),    # aux cols
                pl.BlockSpec((rows, rows), lambda g: (0, 0)),       # w1 (block-diag)
                pl.BlockSpec((rows, rows), lambda g: (0, 0)),       # w2 (block-diag)
            ],
            out_specs=pl.BlockSpec((1, 1), lambda g: (g, 0),
                                   memory_space=pltpu.MemorySpace.SMEM),
        ),
        compiler_params=pltpu.CompilerParams(
            dimension_semantics=("parallel",)),                     # megacore on v7x
    )(x, nz, aux, w1blk, w2blk)

    return jnp.sum(partial) / (B * C * H * W)


# ----------------------------------------------------------------------------
# Pure-JAX reference (for correctness check)
# ----------------------------------------------------------------------------
def reference_loss(x_nchw, noise_nchw, t, params, sched, num_timesteps):
    B, C, H, W = x_nchw.shape
    sa = sched["sqrt_alphas_bar"][t].reshape(B, 1, 1, 1)
    sb = sched["sqrt_one_minus_alphas_bar"][t].reshape(B, 1, 1, 1)
    img_noise = sa * x_nchw + sb * noise_nchw                       # NCHW

    t_norm = (t.astype(jnp.float32) / num_timesteps)[:, None]
    h_t = t_norm @ params["w1"] + params["b1"]
    h_t = h_t * jax.nn.sigmoid(h_t)
    temb = h_t @ params["w2"] + params["b2"]                        # (B, C)

    xn = jnp.transpose(img_noise, (0, 2, 3, 1))                     # (B, H, W, C)
    h = jnp.einsum("bhwc,cd->bhwd", xn, params["wc1"]) \
        + params["bc1"][0] + temb[:, None, None, :]
    h = h * jax.nn.sigmoid(h)
    recon = jnp.einsum("bhwc,cd->bhwd", h, params["wc2"]) + params["bc2"][0]
    return jnp.mean(jnp.abs(xn - recon))


# ----------------------------------------------------------------------------
if __name__ == "__main__":
    B, C, H, W = 2, 4, 16, 16
    HIDDEN = 32
    NUM_TIMESTEPS = 10

    key = jax.random.PRNGKey(0)
    k_x, k_t, k_noise, k_w1, k_w2, k_wc1, k_wc2 = jax.random.split(key, 7)

    # deterministic example input + the RNG draws the PyTorch forward() makes
    x = jax.random.normal(k_x, (B, C, H, W), dtype=jnp.float32)
    t = jax.random.randint(k_t, (B,), 0, NUM_TIMESTEPS)
    noise = jax.random.normal(k_noise, (B, C, H, W), dtype=jnp.float32)

    # deterministic synthetic denoise-model parameters
    params = {
        "w1": 0.5 * jax.random.normal(k_w1, (1, HIDDEN), dtype=jnp.float32),
        "b1": jnp.zeros((HIDDEN,), dtype=jnp.float32),
        "w2": 0.2 * jax.random.normal(k_w2, (HIDDEN, C), dtype=jnp.float32),
        "b2": jnp.zeros((C,), dtype=jnp.float32),
        "wc1": 0.3 * jax.random.normal(k_wc1, (C, C), dtype=jnp.float32),
        "bc1": jnp.full((1, C), 0.01, dtype=jnp.float32),
        "wc2": 0.3 * jax.random.normal(k_wc2, (C, C), dtype=jnp.float32),
        "bc2": jnp.full((1, C), -0.01, dtype=jnp.float32),
    }

    sched = make_schedule(NUM_TIMESTEPS)

    loss = ddpm_forward_loss(x, noise, t, params, sched, NUM_TIMESTEPS)
    loss = jax.block_until_ready(loss)

    ref = reference_loss(x, noise, t, params, sched, NUM_TIMESTEPS)
    assert jnp.allclose(loss, ref, rtol=1e-3, atol=1e-3), (loss, ref)

    print("KERNEL_OK")
</pallas_src>

<mosaic_0001>
module attributes {stable_mosaic.version = 11 : i64} {
  func.func @ddpm_kernel(%arg0: i32, %arg1: memref<1x8x256xf32, #tpu.memory_space<vmem>>, %arg2: memref<1x8x256xf32, #tpu.memory_space<vmem>>, %arg3: memref<1x8x4xf32, #tpu.memory_space<vmem>>, %arg4: memref<8x8xf32, #tpu.memory_space<vmem>>, %arg5: memref<8x8xf32, #tpu.memory_space<vmem>>, %arg6: memref<1x1xf32, #tpu.memory_space<smem>>) attributes {dimension_semantics = [#tpu.dimension_semantics<parallel>], iteration_bounds = array<i64: 1>, scalar_prefetch = 0 : i64, scratch_operands = 0 : i64, tpu.core_type = #tpu.core_type<tc>, window_params = [{transform_indices = @transform_0, window_bounds = array<i64: 1, 8, 256>}, {transform_indices = @transform_1, window_bounds = array<i64: 1, 8, 256>}, {transform_indices = @transform_2, window_bounds = array<i64: 1, 8, 4>}, {pipeline_mode = #tpu.pipeline_mode<synchronous>, transform_indices = @transform_3, window_bounds = array<i64: 8, 8>}, {pipeline_mode = #tpu.pipeline_mode<synchronous>, transform_indices = @transform_4, window_bounds = array<i64: 8, 8>}, {transform_indices = @transform_5, window_bounds = array<i64: 1, 1>}]} {
    %c0 = arith.constant 0 : index
    %c0_0 = arith.constant 0 : index
    %c0_1 = arith.constant 0 : index
    %0 = vector.load %arg1[%c0, %c0_0, %c0_1] : memref<1x8x256xf32, #tpu.memory_space<vmem>>, vector<1x8x256xf32>
    %1 = vector.shape_cast %0 : vector<1x8x256xf32> to vector<8x256xf32>
    %c0_2 = arith.constant 0 : index
    %c0_3 = arith.constant 0 : index
    %c0_4 = arith.constant 0 : index
    %2 = vector.load %arg2[%c0_2, %c0_3, %c0_4] : memref<1x8x256xf32, #tpu.memory_space<vmem>>, vector<1x8x256xf32>
    %3 = vector.shape_cast %2 : vector<1x8x256xf32> to vector<8x256xf32>
    %c0_5 = arith.constant 0 : index
    %c0_6 = arith.constant 0 : index
    %c0_7 = arith.constant 0 : index
    %4 = vector.load %arg3[%c0_5, %c0_6, %c0_7] : memref<1x8x4xf32, #tpu.memory_space<vmem>>, vector<1x8x4xf32>
    %5 = vector.shape_cast %4 : vector<1x8x4xf32> to vector<8x4xf32>
    %6 = vector.extract_strided_slice %5 {offsets = [0, 0], sizes = [8, 1], strides = [1, 1]} : vector<8x4xf32> to vector<8x1xf32>
    %7 = vector.extract_strided_slice %5 {offsets = [0, 1], sizes = [8, 1], strides = [1, 1]} : vector<8x4xf32> to vector<8x1xf32>
    %8 = vector.extract_strided_slice %5 {offsets = [0, 2], sizes = [8, 1], strides = [1, 1]} : vector<8x4xf32> to vector<8x1xf32>
    %9 = vector.extract_strided_slice %5 {offsets = [0, 3], sizes = [8, 1], strides = [1, 1]} : vector<8x4xf32> to vector<8x1xf32>
    %10 = vector.broadcast %6 : vector<8x1xf32> to vector<8x256xf32>
    %11 = arith.mulf %10, %1 : vector<8x256xf32>
    %12 = vector.broadcast %7 : vector<8x1xf32> to vector<8x256xf32>
    %13 = arith.mulf %12, %3 : vector<8x256xf32>
    %14 = arith.addf %11, %13 : vector<8x256xf32>
    %c0_8 = arith.constant 0 : index
    %c0_9 = arith.constant 0 : index
    %15 = vector.load %arg4[%c0_8, %c0_9] : memref<8x8xf32, #tpu.memory_space<vmem>>, vector<8x8xf32>
    %16 = vector.extract_strided_slice %15 {offsets = [0, 0], sizes = [8, 1], strides = [1, 1]} : vector<8x8xf32> to vector<8x1xf32>
    %17 = vector.extract_strided_slice %14 {offsets = [0, 0], sizes = [1, 256], strides = [1, 1]} : vector<8x256xf32> to vector<1x256xf32>
    %18 = vector.broadcast %16 : vector<8x1xf32> to vector<8x256xf32>
    %19 = vector.broadcast %17 : vector<1x256xf32> to vector<8x256xf32>
    %20 = arith.mulf %18, %19 : vector<8x256xf32>
    %21 = vector.extract_strided_slice %15 {offsets = [0, 1], sizes = [8, 1], strides = [1, 1]} : vector<8x8xf32> to vector<8x1xf32>
    %22 = vector.extract_strided_slice %14 {offsets = [1, 0], sizes = [1, 256], strides = [1, 1]} : vector<8x256xf32> to vector<1x256xf32>
    %23 = vector.broadcast %21 : vector<8x1xf32> to vector<8x256xf32>
    %24 = vector.broadcast %22 : vector<1x256xf32> to vector<8x256xf32>
    %25 = arith.mulf %23, %24 : vector<8x256xf32>
    %26 = vector.extract_strided_slice %15 {offsets = [0, 2], sizes = [8, 1], strides = [1, 1]} : vector<8x8xf32> to vector<8x1xf32>
    %27 = vector.extract_strided_slice %14 {offsets = [2, 0], sizes = [1, 256], strides = [1, 1]} : vector<8x256xf32> to vector<1x256xf32>
    %28 = vector.broadcast %26 : vector<8x1xf32> to vector<8x256xf32>
    %29 = vector.broadcast %27 : vector<1x256xf32> to vector<8x256xf32>
    %30 = arith.mulf %28, %29 : vector<8x256xf32>
    %31 = vector.extract_strided_slice %15 {offsets = [0, 3], sizes = [8, 1], strides = [1, 1]} : vector<8x8xf32> to vector<8x1xf32>
    %32 = vector.extract_strided_slice %14 {offsets = [3, 0], sizes = [1, 256], strides = [1, 1]} : vector<8x256xf32> to vector<1x256xf32>
    %33 = vector.broadcast %31 : vector<8x1xf32> to vector<8x256xf32>
    %34 = vector.broadcast %32 : vector<1x256xf32> to vector<8x256xf32>
    %35 = arith.mulf %33, %34 : vector<8x256xf32>
    %36 = vector.extract_strided_slice %15 {offsets = [0, 4], sizes = [8, 1], strides = [1, 1]} : vector<8x8xf32> to vector<8x1xf32>
    %37 = vector.extract_strided_slice %14 {offsets = [4, 0], sizes = [1, 256], strides = [1, 1]} : vector<8x256xf32> to vector<1x256xf32>
    %38 = vector.broadcast %36 : vector<8x1xf32> to vector<8x256xf32>
    %39 = vector.broadcast %37 : vector<1x256xf32> to vector<8x256xf32>
    %40 = arith.mulf %38, %39 : vector<8x256xf32>
    %41 = vector.extract_strided_slice %15 {offsets = [0, 5], sizes = [8, 1], strides = [1, 1]} : vector<8x8xf32> to vector<8x1xf32>
    %42 = vector.extract_strided_slice %14 {offsets = [5, 0], sizes = [1, 256], strides = [1, 1]} : vector<8x256xf32> to vector<1x256xf32>
    %43 = vector.broadcast %41 : vector<8x1xf32> to vector<8x256xf32>
    %44 = vector.broadcast %42 : vector<1x256xf32> to vector<8x256xf32>
    %45 = arith.mulf %43, %44 : vector<8x256xf32>
    %46 = vector.extract_strided_slice %15 {offsets = [0, 6], sizes = [8, 1], strides = [1, 1]} : vector<8x8xf32> to vector<8x1xf32>
    %47 = vector.extract_strided_slice %14 {offsets = [6, 0], sizes = [1, 256], strides = [1, 1]} : vector<8x256xf32> to vector<1x256xf32>
    %48 = vector.broadcast %46 : vector<8x1xf32> to vector<8x256xf32>
    %49 = vector.broadcast %47 : vector<1x256xf32> to vector<8x256xf32>
    %50 = arith.mulf %48, %49 : vector<8x256xf32>
    %51 = vector.extract_strided_slice %15 {offsets = [0, 7], sizes = [8, 1], strides = [1, 1]} : vector<8x8xf32> to vector<8x1xf32>
    %52 = vector.extract_strided_slice %14 {offsets = [7, 0], sizes = [1, 256], strides = [1, 1]} : vector<8x256xf32> to vector<1x256xf32>
    %53 = vector.broadcast %51 : vector<8x1xf32> to vector<8x256xf32>
    %54 = vector.broadcast %52 : vector<1x256xf32> to vector<8x256xf32>
    %55 = arith.mulf %53, %54 : vector<8x256xf32>
    %56 = arith.addf %20, %25 : vector<8x256xf32>
    %57 = arith.addf %30, %35 : vector<8x256xf32>
    %58 = arith.addf %40, %45 : vector<8x256xf32>
    %59 = arith.addf %50, %55 : vector<8x256xf32>
    %60 = arith.addf %56, %57 : vector<8x256xf32>
    %61 = arith.addf %58, %59 : vector<8x256xf32>
    %62 = arith.addf %60, %61 : vector<8x256xf32>
    %63 = vector.broadcast %8 : vector<8x1xf32> to vector<8x256xf32>
    %64 = arith.addf %62, %63 : vector<8x256xf32>
    %65 = arith.negf %64 : vector<8x256xf32>
    %66 = math.exp %65 : vector<8x256xf32>
    %cst = arith.constant 1.000000e+00 : f32
    %67 = vector.broadcast %cst : f32 to vector<8x256xf32>
    %68 = arith.addf %67, %66 : vector<8x256xf32>
    %69 = arith.divf %67, %68 : vector<8x256xf32>
    %70 = arith.mulf %64, %69 : vector<8x256xf32>
    %c0_10 = arith.constant 0 : index
    %c0_11 = arith.constant 0 : index
    %71 = vector.load %arg5[%c0_10, %c0_11] : memref<8x8xf32, #tpu.memory_space<vmem>>, vector<8x8xf32>
    %72 = vector.extract_strided_slice %71 {offsets = [0, 0], sizes = [8, 1], strides = [1, 1]} : vector<8x8xf32> to vector<8x1xf32>
    %73 = vector.extract_strided_slice %70 {offsets = [0, 0], sizes = [1, 256], strides = [1, 1]} : vector<8x256xf32> to vector<1x256xf32>
    %74 = vector.broadcast %72 : vector<8x1xf32> to vector<8x256xf32>
    %75 = vector.broadcast %73 : vector<1x256xf32> to vector<8x256xf32>
    %76 = arith.mulf %74, %75 : vector<8x256xf32>
    %77 = vector.extract_strided_slice %71 {offsets = [0, 1], sizes = [8, 1], strides = [1, 1]} : vector<8x8xf32> to vector<8x1xf32>
    %78 = vector.extract_strided_slice %70 {offsets = [1, 0], sizes = [1, 256], strides = [1, 1]} : vector<8x256xf32> to vector<1x256xf32>
    %79 = vector.broadcast %77 : vector<8x1xf32> to vector<8x256xf32>
    %80 = vector.broadcast %78 : vector<1x256xf32> to vector<8x256xf32>
    %81 = arith.mulf %79, %80 : vector<8x256xf32>
    %82 = vector.extract_strided_slice %71 {offsets = [0, 2], sizes = [8, 1], strides = [1, 1]} : vector<8x8xf32> to vector<8x1xf32>
    %83 = vector.extract_strided_slice %70 {offsets = [2, 0], sizes = [1, 256], strides = [1, 1]} : vector<8x256xf32> to vector<1x256xf32>
    %84 = vector.broadcast %82 : vector<8x1xf32> to vector<8x256xf32>
    %85 = vector.broadcast %83 : vector<1x256xf32> to vector<8x256xf32>
    %86 = arith.mulf %84, %85 : vector<8x256xf32>
    %87 = vector.extract_strided_slice %71 {offsets = [0, 3], sizes = [8, 1], strides = [1, 1]} : vector<8x8xf32> to vector<8x1xf32>
    %88 = vector.extract_strided_slice %70 {offsets = [3, 0], sizes = [1, 256], strides = [1, 1]} : vector<8x256xf32> to vector<1x256xf32>
    %89 = vector.broadcast %87 : vector<8x1xf32> to vector<8x256xf32>
    %90 = vector.broadcast %88 : vector<1x256xf32> to vector<8x256xf32>
    %91 = arith.mulf %89, %90 : vector<8x256xf32>
    %92 = vector.extract_strided_slice %71 {offsets = [0, 4], sizes = [8, 1], strides = [1, 1]} : vector<8x8xf32> to vector<8x1xf32>
    %93 = vector.extract_strided_slice %70 {offsets = [4, 0], sizes = [1, 256], strides = [1, 1]} : vector<8x256xf32> to vector<1x256xf32>
    %94 = vector.broadcast %92 : vector<8x1xf32> to vector<8x256xf32>
    %95 = vector.broadcast %93 : vector<1x256xf32> to vector<8x256xf32>
    %96 = arith.mulf %94, %95 : vector<8x256xf32>
    %97 = vector.extract_strided_slice %71 {offsets = [0, 5], sizes = [8, 1], strides = [1, 1]} : vector<8x8xf32> to vector<8x1xf32>
    %98 = vector.extract_strided_slice %70 {offsets = [5, 0], sizes = [1, 256], strides = [1, 1]} : vector<8x256xf32> to vector<1x256xf32>
    %99 = vector.broadcast %97 : vector<8x1xf32> to vector<8x256xf32>
    %100 = vector.broadcast %98 : vector<1x256xf32> to vector<8x256xf32>
    %101 = arith.mulf %99, %100 : vector<8x256xf32>
    %102 = vector.extract_strided_slice %71 {offsets = [0, 6], sizes = [8, 1], strides = [1, 1]} : vector<8x8xf32> to vector<8x1xf32>
    %103 = vector.extract_strided_slice %70 {offsets = [6, 0], sizes = [1, 256], strides = [1, 1]} : vector<8x256xf32> to vector<1x256xf32>
    %104 = vector.broadcast %102 : vector<8x1xf32> to vector<8x256xf32>
    %105 = vector.broadcast %103 : vector<1x256xf32> to vector<8x256xf32>
    %106 = arith.mulf %104, %105 : vector<8x256xf32>
    %107 = vector.extract_strided_slice %71 {offsets = [0, 7], sizes = [8, 1], strides = [1, 1]} : vector<8x8xf32> to vector<8x1xf32>
    %108 = vector.extract_strided_slice %70 {offsets = [7, 0], sizes = [1, 256], strides = [1, 1]} : vector<8x256xf32> to vector<1x256xf32>
    %109 = vector.broadcast %107 : vector<8x1xf32> to vector<8x256xf32>
    %110 = vector.broadcast %108 : vector<1x256xf32> to vector<8x256xf32>
    %111 = arith.mulf %109, %110 : vector<8x256xf32>
    %112 = arith.addf %76, %81 : vector<8x256xf32>
    %113 = arith.addf %86, %91 : vector<8x256xf32>
    %114 = arith.addf %96, %101 : vector<8x256xf32>
    %115 = arith.addf %106, %111 : vector<8x256xf32>
    %116 = arith.addf %112, %113 : vector<8x256xf32>
    %117 = arith.addf %114, %115 : vector<8x256xf32>
    %118 = arith.addf %116, %117 : vector<8x256xf32>
    %119 = vector.broadcast %9 : vector<8x1xf32> to vector<8x256xf32>
    %120 = arith.addf %118, %119 : vector<8x256xf32>
    %121 = arith.subf %14, %120 : vector<8x256xf32>
    %122 = math.absf %121 : vector<8x256xf32>
    %123 = vector.shape_cast %122 : vector<8x256xf32> to vector<1x8x256xf32>
    %cst_12 = arith.constant dense<0.000000e+00> : vector<1xf32>
    %124 = vector.multi_reduction <add>, %123, %cst_12 [1, 2] : vector<1x8x256xf32> to vector<1xf32>
    %125 = vector.shape_cast %124 : vector<1xf32> to vector<1x1x1xf32>
    %126 = vector.extract %125[0, 0, 0] : f32 from vector<1x1x1xf32>
    %c0_13 = arith.constant 0 : index
    %c0_14 = arith.constant 0 : index
    %127 = memref.load %arg6[%c0_13, %c0_14] : memref<1x1xf32, #tpu.memory_space<smem>>
    memref.store %126, %arg6[%c0_13, %c0_14] : memref<1x1xf32, #tpu.memory_space<smem>>
    return
  }
  func.func @transform_0(%arg0: i32) -> (i32, i32, i32) {
    %c0_i32 = arith.constant 0 : i32
    %c0_i32_0 = arith.constant 0 : i32
    %c0_i32_1 = arith.constant 0 : i32
    return %arg0, %c0_i32, %c0_i32_0 : i32, i32, i32
  }
  func.func @transform_1(%arg0: i32) -> (i32, i32, i32) {
    %c0_i32 = arith.constant 0 : i32
    %c0_i32_0 = arith.constant 0 : i32
    %c0_i32_1 = arith.constant 0 : i32
    return %arg0, %c0_i32, %c0_i32_0 : i32, i32, i32
  }
  func.func @transform_2(%arg0: i32) -> (i32, i32, i32) {
    %c0_i32 = arith.constant 0 : i32
    %c0_i32_0 = arith.constant 0 : i32
    %c0_i32_1 = arith.constant 0 : i32
    return %arg0, %c0_i32, %c0_i32_0 : i32, i32, i32
  }
  func.func @transform_3(%arg0: i32) -> (i32, i32) {
    %c0_i32 = arith.constant 0 : i32
    %c0_i32_0 = arith.constant 0 : i32
    %c0_i32_1 = arith.constant 0 : i32
    return %c0_i32, %c0_i32_0 : i32, i32
  }
  func.func @transform_4(%arg0: i32) -> (i32, i32) {
    %c0_i32 = arith.constant 0 : i32
    %c0_i32_0 = arith.constant 0 : i32
    %c0_i32_1 = arith.constant 0 : i32
    return %c0_i32, %c0_i32_0 : i32, i32
  }
  func.func @transform_5(%arg0: i32) -> (i32, i32) {
    %c0_i32 = arith.constant 0 : i32
    %c0_i32_0 = arith.constant 0 : i32
    return %arg0, %c0_i32 : i32, i32
  }
}

</mosaic_0001>

<bundles_post_ra>
// kernel: tpu_custom_call.1
= control target key start
LH: loop header
LB: loop body
LE: loop exit
PB: predicated region body
PF: predicated region fallthrough
CT: control target
= control target key end

     0   :  { %10 = vsyncpa [#allocation3], 0  ;;  %s605_s0 = inlined_call_operand.hbm [shape: f32[1,8,256], index: 0, kind: input, shape index: {}]   ;;  %s606_s1 = inlined_call_operand.hbm [shape: f32[1,8,256], index: 1, kind: input, shape index: {}]   ;;  %s607_s2 = inlined_call_operand.vmem [shape: f32[1,8,4], index: 2, kind: input, shape index: {}]   ;;  %s608_s3 = inlined_call_operand.vmem [shape: f32[8,8], index: 3, kind: input, shape index: {}]   ;;  %s609_s4 = inlined_call_operand.vmem [shape: f32[8,8], index: 4, kind: input, shape index: {}]   ;;  %s610_s5 = inlined_call_operand.hbm [shape: f32[1,1], index: 5, kind: output, shape index: {}]  }
   0x1   :  { %11 = vsyncpa [#allocation6], 0 }
   0x2   :  { %12 = vsyncpa [#allocation4], 0  ;;  %s476_s18 = smov [#allocation2]   ;;  %s477_s20 = smov [#allocation5]  }
   0x3   :  { %s19_s19 = sshll.u32 %s476_s18, 4  ;;  %s29_s21 = sshll.u32 %s477_s20, 4  ;;  %s20_s19 = int_to_ptr.vmem [resolvable:$true] %s19_s19  ;;  %s30_s21 = int_to_ptr.vmem [resolvable:$true] %s29_s21 }
   0x4   :  { %s430_s22 = scalar_lea.vmem %s20_s19, 256  ;;  %p435_p1 = scmp.lt.s32.totalorder %s20_s19, %s20_s19 }
   0x5   :  { %p431_p0 = scmp.ne.s32.totalorder %s20_s19, %s430_s22  ;;  %p436_p2 = scmp.lt.s32.totalorder %s430_s22, %s430_s22 }
   0x7   :  { %p437_p3 = por %p436_p2, %p435_p1 }
   0x9   :  { %p438_p4 = pnand %p437_p3, %p431_p0 }
   0xb   :  { %441 = shalt.err (!%p438_p4)
}
   0xc   :  { %22 = dma.hbm_to_vmem [thread:$0]  %s605_s0, 256, %s20_s19, [#allocation3]  }
   0xd   :  { %s450_s25 = scalar_lea.vmem %s30_s21, 256  ;;  %p455_p6 = scmp.lt.s32.totalorder %s30_s21, %s30_s21 }
   0xe   :  { %p451_p5 = scmp.ne.s32.totalorder %s30_s21, %s450_s25  ;;  %p456_p7 = scmp.lt.s32.totalorder %s450_s25, %s450_s25 }
  0x10   :  { %p457_p8 = por %p456_p7, %p455_p6 }
  0x12   :  { %p458_p9 = pnand %p457_p8, %p451_p5 }
  0x14   :  { %461 = shalt.err (!%p458_p9)
}
  0x15   :  { %32 = dma.hbm_to_vmem [thread:$0]  %s606_s1, 256, %s30_s21, [#allocation6]  }
  0x16   :  { %470 = dma.done.wait [#allocation3], 256  }
  0x17   :  { %471 = vsyncadd [#allocation3], 4294967040 }
  0x18   :  { %472 = dma.done.wait [#allocation6], 256  }
  0x19   :  { %473 = vsyncadd [#allocation6], 4294967040  ;;  %v478_v0 = vmov 0   ;;  %v65_v1 = vld [vmem:[%s608_s3] sm:$0xff]  ;;  %v479_v3 = vmov 1   ;;  %v480_v4 = vmov 2   ;;  %v71_v13 = vlaneseq }
  0x1a   :  { %395 = vset.pattern.permute.xlu1 %v478_v0  ;;  %393 = vset.pattern.permute.xlu0 %v478_v0  ;;  %v49_v2 = vld [vmem:[%s607_s2] sm:$0xff]  ;;  %v481_v5 = vmov 3   ;;  %v482_v6 = vmov 4   ;;  %v483_v7 = vmov 6   ;;  %v484_v8 = vmov 5   ;;  %v46_v15 = vld [vmem:[#allocation2 + $0x8] sm:$0xff] }
  0x1b   :  { %68 = vperm.xlu1 %395, %v65_v1   ;;  %52 = vperm.xlu0 %393, %v49_v2   ;;  %v213_v9 = vld [vmem:[%s609_s4] sm:$0xff]  ;;  %v485_v10 = vmov 7   ;;  %v47_v18 = vld [vmem:[#allocation5] sm:$0xff]  ;;  %v48_v19 = vld [vmem:[#allocation5 + $0x8] sm:$0xff]  ;;  %v72_v20 = vshrl.u32 %v71_v13, 7  ;;  %s486_s4 = smov [#allocation7]  }
  0x1c   :  { %v45_v14 = vld [vmem:[#allocation2] sm:$0xff] }
  0x1d   :  { %v536_v28 = vsub.s32 2, %v72_v20  ;;  %v538_v29 = vsub.s32 3, %v72_v20  ;;  %v540_v30 = vsub.s32 0, %v72_v20  ;;  %v542_v31 = vsub.s32 1, %v72_v20 }
  0x1e   :  { %v544_v32 = vsub.s32 4, %v72_v20  ;;  %v554_v39 = vsub.s32 6, %v72_v20  ;;  %v556_v40 = vsub.s32 5, %v72_v20  ;;  %v570_v47 = vsub.s32 7, %v72_v20 }
  0x1f   :  { %396 = vset.pattern.permute.xlu1 %v479_v3  ;;  %394 = vset.pattern.permute.xlu0 %v479_v3 }
  0x20   :  { %82 = vperm.xlu1 %396, %v65_v1   ;;  %58 = vperm.xlu0 %394, %v49_v2  }
  0x24   :  { %397 = vset.pattern.permute.xlu1 %v480_v4  ;;  %398 = vset.pattern.permute.xlu0 %v481_v5 }
  0x25   :  { %96 = vperm.xlu1 %397, %v65_v1   ;;  %110 = vperm.xlu0 %398, %v65_v1  }
  0x29   :  { %399 = vset.pattern.permute.xlu1 %v482_v6  ;;  %401 = vset.pattern.permute.xlu0 %v483_v7 }
  0x2a   :  { %124 = vperm.xlu1 %399, %v65_v1   ;;  %152 = vperm.xlu0 %401, %v65_v1  }
  0x2e   :  { %400 = vset.pattern.permute.xlu1 %v484_v8  ;;  %404 = vset.pattern.permute.xlu0 %v478_v0 }
  0x2f   :  { %138 = vperm.xlu1 %400, %v65_v1   ;;  %216 = vperm.xlu0 %404, %v213_v9  }
  0x33   :  { %402 = vset.pattern.permute.xlu1 %v485_v10  ;;  %407 = vset.pattern.permute.xlu0 %v481_v5 }
  0x34   :  { %166 = vperm.xlu1 %402, %v65_v1   ;;  %258 = vperm.xlu0 %407, %v213_v9  }
  0x38   :  { %403 = vset.pattern.permute.xlu1 %v480_v4  ;;  %410 = vset.pattern.permute.xlu0 %v483_v7 }
  0x39   :  { %194 = vperm.xlu1 %403, %v49_v2   ;;  %300 = vperm.xlu0 %410, %v213_v9  }
  0x3d   :  { %405 = vset.pattern.permute.xlu1 %v479_v3  ;;  %413 = vset.pattern.permute.xlu0 %v481_v5 }
  0x3e   :  { %230 = vperm.xlu1 %405, %v213_v9  }
  0x42   :  { %406 = vset.pattern.permute.xlu1 %v480_v4 }
  0x43   :  { %244 = vperm.xlu1 %406, %v213_v9  }
  0x47   :  { %408 = vset.pattern.permute.xlu1 %v482_v6 }
  0x48   :  { %272 = vperm.xlu1 %408, %v213_v9  }
  0x4c   :  { %409 = vset.pattern.permute.xlu1 %v484_v8 }
  0x4d   :  { %286 = vperm.xlu1 %409, %v213_v9  }
  0x51   :  { %411 = vset.pattern.permute.xlu1 %v485_v10 }
  0x52   :  { %314 = vperm.xlu1 %411, %v213_v9  }
  0x56   :  { %412 = vset.pattern.permute.xlu1 %v481_v5 }
  0x57   :  { %342 = vperm.xlu1 %412, %v49_v2  }
  0x96   :  { %v69_v11 = vpop.permute.xlu1 %68  ;;  %v53_v12 = vpop.permute.xlu0 %52 }
  0x97   :  { %v55_v21 = vmul.f32 %v53_v12, %v45_v14  ;;  %v56_v22 = vmul.f32 %v53_v12, %v46_v15 }
  0x9b   :  { %v83_v16 = vpop.permute.xlu1 %82  ;;  %v59_v17 = vpop.permute.xlu0 %58 }
  0x9c   :  { %v61_v23 = vmul.f32 %v59_v17, %v47_v18  ;;  %v62_v24 = vmul.f32 %v59_v17, %v48_v19 }
  0x9e   :  { %v532_v26 = vadd.f32 %v61_v23, %v55_v21  ;;  %v534_v27 = vadd.f32 %v62_v24, %v56_v22 }
  0xa0   :  { %v97_v25 = vpop.permute.xlu1 %96  ;;  %v102_v34 = vrot.slane %v532_v26, %v536_v28  ;;  %v106_v35 = vrot.slane %v534_v27, %v536_v28  ;;  %v111_v36 = vpop.permute.xlu0 %110  ;;  %v116_v37 = vrot.slane %v532_v26, %v538_v29  ;;  %v120_v38 = vrot.slane %v534_v27, %v538_v29 }
  0xa1   :  { %v74_v41 = vrot.slane %v532_v26, %v540_v30  ;;  %v78_v42 = vrot.slane %v534_v27, %v540_v30  ;;  %v88_v43 = vrot.slane %v532_v26, %v542_v31  ;;  %v92_v44 = vrot.slane %v534_v27, %v542_v31 }
  0xa2   :  { %v130_v45 = vrot.slane %v532_v26, %v544_v32  ;;  %v134_v46 = vrot.slane %v534_v27, %v544_v32  ;;  %v107_v48 = vmul.f32 %v102_v34, %v97_v25  ;;  %v108_v49 = vmul.f32 %v106_v35, %v97_v25 }
  0xa3   :  { %v121_v50 = vmul.f32 %v116_v37, %v111_v36  ;;  %v122_v51 = vmul.f32 %v120_v38, %v111_v36  ;;  %v158_v53 = vrot.slane %v532_v26, %v554_v39  ;;  %v162_v54 = vrot.slane %v534_v27, %v554_v39 }
  0xa4   :  { %v144_v55 = vrot.slane %v532_v26, %v556_v40  ;;  %v148_v56 = vrot.slane %v534_v27, %v556_v40  ;;  %v79_v58 = vmul.f32 %v74_v41, %v69_v11  ;;  %v80_v59 = vmul.f32 %v78_v42, %v69_v11 }
  0xa5   :  { %v125_v33 = vpop.permute.xlu1 %124  ;;  %v153_v57 = vpop.permute.xlu0 %152  ;;  %v93_v60 = vmul.f32 %v88_v43, %v83_v16  ;;  %v94_v61 = vmul.f32 %v92_v44, %v83_v16  ;;  %v172_v62 = vrot.slane %v532_v26, %v570_v47  ;;  %v176_v63 = vrot.slane %v534_v27, %v570_v47 }
  0xa6   :  { %v181_v0 = vadd.f32 %v121_v50, %v107_v48  ;;  %v182_v1 = vadd.f32 %v122_v51, %v108_v49  ;;  %v135_v4 = vmul.f32 %v130_v45, %v125_v33  ;;  %v136_v5 = vmul.f32 %v134_v46, %v125_v33 }
  0xa7   :  { %v163_v6 = vmul.f32 %v158_v53, %v153_v57  ;;  %v164_v7 = vmul.f32 %v162_v54, %v153_v57  ;;  %v179_v11 = vadd.f32 %v93_v60, %v79_v58  ;;  %v180_v12 = vadd.f32 %v94_v61, %v80_v59 }
  0xa9   :  { %v187_v17 = vadd.f32 %v181_v0, %v179_v11  ;;  %v188_v18 = vadd.f32 %v182_v1, %v180_v12 }
  0xaa   :  { %v139_v52 = vpop.permute.xlu1 %138  ;;  %v217_v44 = vpop.permute.xlu0 %216 }
  0xab   :  { %v149_v2 = vmul.f32 %v144_v55, %v139_v52  ;;  %v150_v3 = vmul.f32 %v148_v56, %v139_v52 }
  0xad   :  { %v183_v13 = vadd.f32 %v149_v2, %v135_v4  ;;  %v184_v14 = vadd.f32 %v150_v3, %v136_v5 }
  0xaf   :  { %v167_v8 = vpop.permute.xlu1 %166  ;;  %v259_v51 = vpop.permute.xlu0 %258 }
  0xb0   :  { %v177_v9 = vmul.f32 %v172_v62, %v167_v8  ;;  %v178_v10 = vmul.f32 %v176_v63, %v167_v8 }
  0xb2   :  { %v185_v15 = vadd.f32 %v177_v9, %v163_v6  ;;  %v186_v16 = vadd.f32 %v178_v10, %v164_v7 }
  0xb4   :  { %v189_v19 = vadd.f32 %v185_v15, %v183_v13  ;;  %v190_v20 = vadd.f32 %v186_v16, %v184_v14  ;;  %v195_v21 = vpop.permute.xlu1 %194  ;;  %v301_v9 = vpop.permute.xlu0 %300 }
  0xb6   :  { %v191_v22 = vadd.f32 %v189_v19, %v187_v17  ;;  %v192_v23 = vadd.f32 %v190_v20, %v188_v18 }
  0xb8   :  { %v197_v24 = vadd.f32 %v195_v21, %v191_v22  ;;  %v198_v25 = vadd.f32 %v195_v21, %v192_v23 }
  0xb9   :  { %v231_v35 = vpop.permute.xlu1 %230 }
  0xba   :  { %v378_v33 = vmul.f32 -1.442695, %v197_v24  ;;  %v379_v34 = vmul.f32 -1.442695, %v198_v25 }
  0xbc   :  { %414 = vpow2.f32 %v378_v33 }
  0xbd   :  { %416 = vpow2.f32 %v379_v34 }
  0xbe   :  { %v245_v42 = vpop.permute.xlu1 %244 }
  0xc3   :  { %v273_v43 = vpop.permute.xlu1 %272 }
  0xc8   :  { %v287_v49 = vpop.permute.xlu1 %286 }
  0xc9   :  { %v415_v36 = vpop.eup %414 }
  0xca   :  { %v417_v37 = vpop.eup %416  ;;  %v205_v38 = vadd.f32 1.0, %v415_v36 }
  0xcb   :  { %v206_v41 = vadd.f32 1.0, %v417_v37 }
  0xcc   :  { %418 = vrcp.f32 %v205_v38 }
  0xcd   :  { %420 = vrcp.f32 %v206_v41 }
  0xd9   :  { %v419_v45 = vpop.eup %418 }
  0xda   :  { %v421_v46 = vpop.eup %420  ;;  %v211_v48 = vmul.f32 %v419_v45, %v197_v24 }
  0xdb   :  { %v212_v50 = vmul.f32 %v421_v46, %v198_v25 }
  0xdc   :  { %v236_v52 = vrot.slane %v211_v48, %v542_v31  ;;  %v250_v53 = vrot.slane %v211_v48, %v536_v28  ;;  %v278_v54 = vrot.slane %v211_v48, %v544_v32  ;;  %v222_v55 = vrot.slane %v211_v48, %v540_v30 }
  0xdd   :  { %v240_v56 = vrot.slane %v212_v50, %v542_v31  ;;  %v254_v57 = vrot.slane %v212_v50, %v536_v28  ;;  %v282_v58 = vrot.slane %v212_v50, %v544_v32  ;;  %v226_v59 = vrot.slane %v212_v50, %v540_v30  ;;  %v315_v28 = vpop.permute.xlu1 %314 }
  0xde   :  { %v241_v60 = vmul.f32 %v236_v52, %v231_v35  ;;  %v255_v61 = vmul.f32 %v250_v53, %v245_v42  ;;  %v283_v62 = vmul.f32 %v278_v54, %v273_v43  ;;  %v227_v63 = vmul.f32 %v222_v55, %v217_v44 }
  0xdf   :  { %v242_v0 = vmul.f32 %v240_v56, %v231_v35  ;;  %v256_v1 = vmul.f32 %v254_v57, %v245_v42  ;;  %v284_v2 = vmul.f32 %v282_v58, %v273_v43  ;;  %v228_v3 = vmul.f32 %v226_v59, %v217_v44 }
  0xe0   :  { %v327_v4 = vadd.f32 %v241_v60, %v227_v63  ;;  %v292_v5 = vrot.slane %v211_v48, %v556_v40  ;;  %v296_v6 = vrot.slane %v212_v50, %v556_v40  ;;  %v264_v31 = vrot.slane %v211_v48, %v538_v29 }
  0xe1   :  { %v328_v7 = vadd.f32 %v242_v0, %v228_v3  ;;  %v268_v32 = vrot.slane %v212_v50, %v538_v29  ;;  %v320_v30 = vrot.slane %v211_v48, %v570_v47  ;;  %v324_v8 = vrot.slane %v212_v50, %v570_v47  ;;  %v343_v33 = vpop.permute.xlu1 %342 }
  0xe2   :  { %v297_v10 = vmul.f32 %v292_v5, %v287_v49  ;;  %v298_v11 = vmul.f32 %v296_v6, %v287_v49  ;;  %v269_v12 = vmul.f32 %v264_v31, %v259_v51  ;;  %v306_v13 = vrot.slane %v211_v48, %v554_v39 }
  0xe3   :  { %v270_v14 = vmul.f32 %v268_v32, %v259_v51  ;;  %v325_v15 = vmul.f32 %v320_v30, %v315_v28  ;;  %v326_v16 = vmul.f32 %v324_v8, %v315_v28  ;;  %v310_v40 = vrot.slane %v212_v50, %v554_v39 }
  0xe4   :  { %v331_v17 = vadd.f32 %v297_v10, %v283_v62  ;;  %v329_v18 = vadd.f32 %v269_v12, %v255_v61  ;;  %v311_v19 = vmul.f32 %v306_v13, %v301_v9  ;;  %v332_v20 = vadd.f32 %v298_v11, %v284_v2 }
  0xe5   :  { %v330_v29 = vadd.f32 %v270_v14, %v256_v1  ;;  %v312_v21 = vmul.f32 %v310_v40, %v301_v9 }
  0xe6   :  { %v333_v22 = vadd.f32 %v325_v15, %v311_v19  ;;  %v335_v23 = vadd.f32 %v329_v18, %v327_v4 }
  0xe7   :  { %v334_v47 = vadd.f32 %v326_v16, %v312_v21  ;;  %v336_v24 = vadd.f32 %v330_v29, %v328_v7 }
  0xe8   :  { %v337_v25 = vadd.f32 %v333_v22, %v331_v17 }
  0xe9   :  { %v338_v34 = vadd.f32 %v334_v47, %v332_v20 }
  0xea   :  { %v339_v35 = vadd.f32 %v337_v25, %v335_v23 }
  0xeb   :  { %v340_v36 = vadd.f32 %v338_v34, %v336_v24 }
  0xec   :  { %v345_v37 = vadd.f32 %v343_v33, %v339_v35 }
  0xed   :  { %v346_v38 = vadd.f32 %v343_v33, %v340_v36 }
  0xee   :  { %v347_v41 = vsub.f32 %v532_v26, %v345_v37 }
  0xef   :  { %v348_v39 = vsub.f32 %v534_v27, %v346_v38 }
  0xf0   :  { %v349_v42 = vand.u32 2147483647, %v347_v41 }
  0xf1   :  { %v350_v43 = vand.u32 2147483647, %v348_v39 }
  0xf3   :  { %v351_v44 = vadd.f32 %v350_v43, %v349_v42 }
  0xf5   :  { %352 = vadd.xlane.f32.xlu0 %v351_v44 }
 0x17e   :  { %v353_v45 = vpop.xlane.xlu0 %352 }
 0x17f   :  { %v354_v46 = vrot.slane %v353_v45, 4 }
 0x181   :  { %v355_v48 = vadd.f32 %v354_v46, %v353_v45 }
 0x183   :  { %v356_v49 = vrot.slane %v355_v48, 2 }
 0x185   :  { %v357_v50 = vadd.f32 %v356_v49, %v355_v48 }
 0x187   :  { %v358_v51 = vrot.slane %v357_v50, 1 }
 0x189   :  { %v359_v52 = vadd.f32 %v358_v51, %v357_v50 }
 0x18b   :  { %380 = vpush %v359_v52 }
 0x1bc   :  { %s381_s3 = spop %380 }
 0x1bd   :  { %362 = sst [smem:[#allocation7]] %s381_s3 }
 0x1be   :  { %370 = dma.smem_to_hbm %s486_s4, 16, %s610_s5, [#allocation4]  }
 0x1bf   :  { %474 = dma.done.wait [#allocation4], 16  }
 0x1c0   :  { %475 = vsyncadd [#allocation4], 4294967280 }
 0x1c1   :  { %374 = sfence }
 0x1c2   :  { %375 = vsyncpa [#allocation3], 1 }
 0x1c3   :  { %376 = vsyncpa [#allocation6], 1 }
 0x1c4   :  { %377 = vsyncpa [#allocation4], 1 }

</bundles_post_ra>
